<compile_context>
chip_gen: v5e
topology: v5e:2x2
jax: 0.10.0
libtpu: 0.0.40
codegen_flags: <defaults>
</compile_context>

<pallas_src>
import jax
import jax.numpy as jnp
from jax import lax
from jax.experimental import pallas as pl
from jax.experimental.pallas import tpu as pltpu

EPS = 1e-5  # nn.BatchNorm2d default


# ---------------------------------------------------------------------------
# Row-tile chooser: largest 8-aligned divisor of `total` whose double-buffered
# tile fits `budget` bytes, preferring an even number (>=2) of grid steps so a
# "parallel" grid axis shards cleanly across v7x's two TensorCores.
# ---------------------------------------------------------------------------
def _pick_rows(total, bytes_per_row, budget=12 << 20, row_target=512):
    cands = [d for d in range(8, total + 1, 8) if total % d == 0]
    if not cands:
        cands = [total]
    fitting = [d for d in cands if 2 * d * bytes_per_row <= budget]
    if not fitting:
        fitting = [min(cands)]

    def score(d):
        steps = total // d
        return (steps >= 2 and steps % 2 == 0,   # even split over 2 TCs (v7x)
                steps >= 2,                      # at least some parallelism
                d <= row_target,                 # amortize ~0.35us/step w/o overshoot
                d if d <= row_target else -d)

    return max(fitting, key=score)


# ---------------------------------------------------------------------------
# Kernel 1: per-channel partial sums / sums-of-squares (BatchNorm statistics).
# Input is the channels-last (R, Cin) view of the tap-split array; each grid
# block writes its own (1, 1, Cin) partial, finalized in the wrapper.
# ---------------------------------------------------------------------------
def _col_stats_kernel(x_ref, s_ref, ss_ref):
    x = x_ref[...].astype(jnp.float32)
    s_ref[0] = jnp.sum(x, axis=0, keepdims=True)
    ss_ref[0] = jnp.sum(x * x, axis=0, keepdims=True)


def pallas_col_stats(x_rows):
    R, C = x_rows.shape
    tr = _pick_rows(R, C * x_rows.dtype.itemsize, budget=8 << 20,
                    row_target=1024)
    G = R // tr
    s, ss = pl.pallas_call(
        _col_stats_kernel,
        out_shape=(jax.ShapeDtypeStruct((G, 1, C), jnp.float32),
                   jax.ShapeDtypeStruct((G, 1, C), jnp.float32)),
        grid=(G,),
        in_specs=[pl.BlockSpec((tr, C), lambda i: (i, 0))],
        out_specs=(pl.BlockSpec((1, 1, C), lambda i: (i, 0, 0)),
                   pl.BlockSpec((1, 1, C), lambda i: (i, 0, 0))),
        compiler_params=pltpu.CompilerParams(
            dimension_semantics=("parallel",),
            vmem_limit_bytes=32 << 20),
    )(x_rows)
    return s.reshape(G, C).sum(axis=0), ss.reshape(G, C).sum(axis=0)


# ---------------------------------------------------------------------------
# Kernel 2: fused BN(scale/shift, 0.25 folded) + ReLU + 2x2 avg-pool + 1x1
# conv (MXU matmul).  taps_ref: (4, tm, Cin) — the four pooling taps.
# ---------------------------------------------------------------------------
def _fused_transition_kernel(taps_ref, sc_ref, sh_ref, w_ref, o_ref):
    x = taps_ref[...].astype(jnp.float32)        # (4, tm, Cin) native->f32
    sc = sc_ref[...]                             # (1, Cin)  gamma/sqrt(var)/4
    sh = sh_ref[...]                             # (1, Cin)  folded shift /4
    z = jnp.maximum(x * sc + sh, 0.0)            # BN + ReLU (pool scale folded)
    pooled = z[0] + z[1] + z[2] + z[3]           # (tm, Cin)  2x2 average pool
    o_ref[...] = jnp.dot(pooled, w_ref[...],
                         preferred_element_type=jnp.float32).astype(o_ref.dtype)


def pallas_fused_transition(taps, scale, shift, w_mat):
    _, M, Cin = taps.shape
    Cout_p = w_mat.shape[1]
    bytes_per_row = 4 * Cin * taps.dtype.itemsize + Cout_p * 4
    tm = _pick_rows(M, bytes_per_row, budget=12 << 20, row_target=512)
    return pl.pallas_call(
        _fused_transition_kernel,
        out_shape=jax.ShapeDtypeStruct((M, Cout_p), jnp.float32),
        grid=(M // tm,),
        in_specs=[pl.BlockSpec((4, tm, Cin), lambda i: (0, i, 0)),
                  pl.BlockSpec((1, Cin), lambda i: (0, 0)),
                  pl.BlockSpec((1, Cin), lambda i: (0, 0)),
                  pl.BlockSpec((Cin, Cout_p), lambda i: (0, 0))],
        out_specs=pl.BlockSpec((tm, Cout_p), lambda i: (i, 0)),
        compiler_params=pltpu.CompilerParams(
            dimension_semantics=("parallel",),
            vmem_limit_bytes=32 << 20),
    )(taps, scale, shift, w_mat)


# ---------------------------------------------------------------------------
# Forward pass (NCHW in / NCHW out, matching the nn.Module API).
# ---------------------------------------------------------------------------
def transition_forward(x_nchw, gamma, beta, conv_w):
    N, Cin, H, W = x_nchw.shape
    Cout = conv_w.shape[0]
    Ho, Wo = H // 2, W // 2
    M = N * Ho * Wo

    # --- single layout pass: NCHW -> tap-split channels-last (4, M, Cin) ----
    xc = x_nchw[:, :, :2 * Ho, :2 * Wo]                 # crop (no-op for even H/W)
    taps = xc.reshape(N, Cin, Ho, 2, Wo, 2)
    taps = jnp.transpose(taps, (3, 5, 0, 2, 4, 1))      # (2, 2, N, Ho, Wo, Cin)
    taps = taps.reshape(4, M, Cin)                      # native dtype kept in HBM

    # --- training-mode BatchNorm batch statistics ---------------------------
    if (H % 2 == 0) and (W % 2 == 0):
        # Tap-split array contains exactly all of x -> stats from the same HBM
        # buffer the fused kernel consumes (pure view, no extra layout pass).
        s, ss = pallas_col_stats(taps.reshape(4 * M, Cin))
    else:
        # TODO(synk): odd H/W — BN stats must also cover the cropped border
        # row/column; rare path, fall back to XLA instead of a second layout pass.
        xf = x_nchw.astype(jnp.float32)
        s = jnp.sum(xf, axis=(0, 2, 3))
        ss = jnp.sum(xf * xf, axis=(0, 2, 3))

    cnt = float(N * H * W)
    mean = s / cnt
    # NOTE: single-pass E[x^2]-E[x]^2 in f32; fine for moderate counts/scales
    # (tolerance 1e-3 here).  Switch to a two-pass reduction if tighter
    # tolerances or huge N*H*W are needed.
    var = jnp.maximum(ss / cnt - mean * mean, 0.0)      # biased variance
    inv = lax.rsqrt(var + EPS)
    g32 = gamma.astype(jnp.float32)
    # Fold the 0.25 avg-pool factor into the BN affine:
    #   0.25*relu(t*sc+sh) == relu(t*(0.25*sc) + 0.25*sh)
    scale = (0.25 * g32 * inv).reshape(1, Cin)
    shift = (0.25 * (beta.astype(jnp.float32) - mean * g32 * inv)).reshape(1, Cin)

    # --- 1x1 conv weight, zero-padded to a lane-dense output width ----------
    w_mat = conv_w[:, :, 0, 0].T.astype(jnp.float32)    # (Cin, Cout)
    Cout_p = ((Cout + 127) // 128) * 128
    if Cout_p != Cout:
        w_mat = jnp.pad(w_mat, ((0, 0), (0, Cout_p - Cout)))

    out2d = pallas_fused_transition(taps, scale, shift, w_mat)   # (M, Cout_p)
    out2d = out2d[:, :Cout]
    return jnp.transpose(out2d.reshape(N, Ho, Wo, Cout), (0, 3, 1, 2))


# ---------------------------------------------------------------------------
# Pure-JAX reference (mirrors the PyTorch module in training mode).
# ---------------------------------------------------------------------------
def reference_transition(x, gamma, beta, conv_w):
    mean = jnp.mean(x, axis=(0, 2, 3), keepdims=True)
    var = jnp.mean((x - mean) ** 2, axis=(0, 2, 3), keepdims=True)
    z = (x - mean) / jnp.sqrt(var + EPS) * gamma.reshape(1, -1, 1, 1) \
        + beta.reshape(1, -1, 1, 1)
    z = jax.nn.relu(z)
    y = lax.conv_general_dilated(z, conv_w, (1, 1), [(0, 0), (0, 0)],
                                 dimension_numbers=("NCHW", "OIHW", "NCHW"))
    N, Co, H, W = y.shape
    y = y[:, :, :2 * (H // 2), :2 * (W // 2)]
    return y.reshape(N, Co, H // 2, 2, W // 2, 2).mean(axis=(3, 5))


if __name__ == "__main__":
    in_planes, out_planes = 16, 32
    N, H, W = 2, 16, 16

    key = jax.random.PRNGKey(0)
    kx, kg, kb, kw = jax.random.split(key, 4)
    x = jax.random.normal(kx, (N, in_planes, H, W), jnp.float32)
    gamma = 1.0 + 0.1 * jax.random.normal(kg, (in_planes,), jnp.float32)
    beta = 0.1 * jax.random.normal(kb, (in_planes,), jnp.float32)
    conv_w = jax.random.normal(kw, (out_planes, in_planes, 1, 1),
                               jnp.float32) / (in_planes ** 0.5)

    fwd = jax.jit(transition_forward)
    out = jax.block_until_ready(fwd(x, gamma, beta, conv_w))

    ref = jax.block_until_ready(reference_transition(x, gamma, beta, conv_w))

    assert out.shape == ref.shape, (out.shape, ref.shape)
    max_err = float(jnp.max(jnp.abs(out - ref)))
    assert max_err < 1e-3, f"max abs error {max_err}"
    print("KERNEL_OK")
</pallas_src>

<mosaic_0001>
module attributes {stable_mosaic.version = 11 : i64} {
  func.func @_col_stats_kernel(%arg0: i32, %arg1: memref<256x16xf32, #tpu.memory_space<vmem>>, %arg2: memref<1x1x16xf32, #tpu.memory_space<vmem>>, %arg3: memref<1x1x16xf32, #tpu.memory_space<vmem>>) attributes {dimension_semantics = [#tpu.dimension_semantics<parallel>], iteration_bounds = array<i64: 2>, scalar_prefetch = 0 : i64, scratch_operands = 0 : i64, tpu.core_type = #tpu.core_type<tc>, window_params = [{transform_indices = @transform_0, window_bounds = array<i64: 256, 16>}, {transform_indices = @transform_1, window_bounds = array<i64: 1, 1, 16>}, {transform_indices = @transform_2, window_bounds = array<i64: 1, 1, 16>}]} {
    %c0 = arith.constant 0 : index
    %c0_0 = arith.constant 0 : index
    %0 = vector.load %arg1[%c0, %c0_0] : memref<256x16xf32, #tpu.memory_space<vmem>>, vector<256x16xf32>
    %cst = arith.constant dense<0.000000e+00> : vector<16xf32>
    %1 = vector.multi_reduction <add>, %0, %cst [0] : vector<256x16xf32> to vector<16xf32>
    %2 = vector.shape_cast %1 : vector<16xf32> to vector<1x16xf32>
    %c0_1 = arith.constant 0 : index
    %c0_2 = arith.constant 0 : index
    %c0_3 = arith.constant 0 : index
    %3 = vector.load %arg2[%c0_1, %c0_2, %c0_3] : memref<1x1x16xf32, #tpu.memory_space<vmem>>, vector<1x1x16xf32>
    %4 = vector.shape_cast %3 : vector<1x1x16xf32> to vector<1x16xf32>
    %5 = vector.shape_cast %2 : vector<1x16xf32> to vector<1x1x16xf32>
    tpu.vector_store %arg2[%c0_1, %c0_2, %c0_3], %5 {strides = array<i32>} : memref<1x1x16xf32, #tpu.memory_space<vmem>>, vector<1x1x16xf32>,
    %6 = arith.mulf %0, %0 : vector<256x16xf32>
    %cst_4 = arith.constant dense<0.000000e+00> : vector<16xf32>
    %7 = vector.multi_reduction <add>, %6, %cst_4 [0] : vector<256x16xf32> to vector<16xf32>
    %8 = vector.shape_cast %7 : vector<16xf32> to vector<1x16xf32>
    %c0_5 = arith.constant 0 : index
    %c0_6 = arith.constant 0 : index
    %c0_7 = arith.constant 0 : index
    %9 = vector.load %arg3[%c0_5, %c0_6, %c0_7] : memref<1x1x16xf32, #tpu.memory_space<vmem>>, vector<1x1x16xf32>
    %10 = vector.shape_cast %9 : vector<1x1x16xf32> to vector<1x16xf32>
    %11 = vector.shape_cast %8 : vector<1x16xf32> to vector<1x1x16xf32>
    tpu.vector_store %arg3[%c0_5, %c0_6, %c0_7], %11 {strides = array<i32>} : memref<1x1x16xf32, #tpu.memory_space<vmem>>, vector<1x1x16xf32>,
    return
  }
  func.func @transform_0(%arg0: i32) -> (i32, i32) {
    %c0_i32 = arith.constant 0 : i32
    %c0_i32_0 = arith.constant 0 : i32
    return %arg0, %c0_i32 : i32, i32
  }
  func.func @transform_1(%arg0: i32) -> (i32, i32, i32) {
    %c0_i32 = arith.constant 0 : i32
    %c0_i32_0 = arith.constant 0 : i32
    %c0_i32_1 = arith.constant 0 : i32
    return %arg0, %c0_i32, %c0_i32_0 : i32, i32, i32
  }
  func.func @transform_2(%arg0: i32) -> (i32, i32, i32) {
    %c0_i32 = arith.constant 0 : i32
    %c0_i32_0 = arith.constant 0 : i32
    %c0_i32_1 = arith.constant 0 : i32
    return %arg0, %c0_i32, %c0_i32_0 : i32, i32, i32
  }
}

module attributes {stable_mosaic.version = 11 : i64} {
  func.func @_fused_transition_kernel(%arg0: i32, %arg1: memref<4x64x16xf32, #tpu.memory_space<vmem>>, %arg2: memref<1x16xf32, #tpu.memory_space<vmem>>, %arg3: memref<1x16xf32, #tpu.memory_space<vmem>>, %arg4: memref<16x128xf32, #tpu.memory_space<vmem>>, %arg5: memref<64x128xf32, #tpu.memory_space<vmem>>) attributes {dimension_semantics = [#tpu.dimension_semantics<parallel>], iteration_bounds = array<i64: 2>, scalar_prefetch = 0 : i64, scratch_operands = 0 : i64, tpu.core_type = #tpu.core_type<tc>, window_params = [{transform_indices = @transform_0, window_bounds = array<i64: 4, 64, 16>}, {pipeline_mode = #tpu.pipeline_mode<synchronous>, transform_indices = @transform_1, window_bounds = array<i64: 1, 16>}, {pipeline_mode = #tpu.pipeline_mode<synchronous>, transform_indices = @transform_2, window_bounds = array<i64: 1, 16>}, {pipeline_mode = #tpu.pipeline_mode<synchronous>, transform_indices = @transform_3, window_bounds = array<i64: 16, 128>}, {transform_indices = @transform_4, window_bounds = array<i64: 64, 128>}]} {
    %c0 = arith.constant 0 : index
    %c0_0 = arith.constant 0 : index
    %c0_1 = arith.constant 0 : index
    %0 = vector.load %arg1[%c0, %c0_0, %c0_1] : memref<4x64x16xf32, #tpu.memory_space<vmem>>, vector<4x64x16xf32>
    %c0_2 = arith.constant 0 : index
    %c0_3 = arith.constant 0 : index
    %1 = vector.load %arg2[%c0_2, %c0_3] : memref<1x16xf32, #tpu.memory_space<vmem>>, vector<1x16xf32>
    %c0_4 = arith.constant 0 : index
    %c0_5 = arith.constant 0 : index
    %2 = vector.load %arg3[%c0_4, %c0_5] : memref<1x16xf32, #tpu.memory_space<vmem>>, vector<1x16xf32>
    %3 = vector.shape_cast %1 : vector<1x16xf32> to vector<1x1x16xf32>
    %4 = vector.broadcast %3 : vector<1x1x16xf32> to vector<4x64x16xf32>
    %5 = arith.mulf %0, %4 : vector<4x64x16xf32>
    %6 = vector.shape_cast %2 : vector<1x16xf32> to vector<1x1x16xf32>
    %7 = vector.broadcast %6 : vector<1x1x16xf32> to vector<4x64x16xf32>
    %8 = arith.addf %5, %7 : vector<4x64x16xf32>
    %cst = arith.constant 0.000000e+00 : f32
    %9 = vector.broadcast %cst : f32 to vector<4x64x16xf32>
    %10 = arith.maximumf %8, %9 : vector<4x64x16xf32>
    %11 = vector.extract_strided_slice %10 {offsets = [0, 0, 0], sizes = [1, 64, 16], strides = [1, 1, 1]} : vector<4x64x16xf32> to vector<1x64x16xf32>
    %12 = vector.shape_cast %11 : vector<1x64x16xf32> to vector<64x16xf32>
    %13 = vector.extract_strided_slice %10 {offsets = [1, 0, 0], sizes = [1, 64, 16], strides = [1, 1, 1]} : vector<4x64x16xf32> to vector<1x64x16xf32>
    %14 = vector.shape_cast %13 : vector<1x64x16xf32> to vector<64x16xf32>
    %15 = arith.addf %12, %14 : vector<64x16xf32>
    %16 = vector.extract_strided_slice %10 {offsets = [2, 0, 0], sizes = [1, 64, 16], strides = [1, 1, 1]} : vector<4x64x16xf32> to vector<1x64x16xf32>
    %17 = vector.shape_cast %16 : vector<1x64x16xf32> to vector<64x16xf32>
    %18 = arith.addf %15, %17 : vector<64x16xf32>
    %19 = vector.extract_strided_slice %10 {offsets = [3, 0, 0], sizes = [1, 64, 16], strides = [1, 1, 1]} : vector<4x64x16xf32> to vector<1x64x16xf32>
    %20 = vector.shape_cast %19 : vector<1x64x16xf32> to vector<64x16xf32>
    %21 = arith.addf %18, %20 : vector<64x16xf32>
    %c0_6 = arith.constant 0 : index
    %c0_7 = arith.constant 0 : index
    %22 = vector.load %arg4[%c0_6, %c0_7] : memref<16x128xf32, #tpu.memory_space<vmem>>, vector<16x128xf32>
    %cst_8 = arith.constant dense<0.000000e+00> : vector<64x128xf32>
    %23 = tpu.matmul %21, %22, %cst_8 {dimension_numbers = #tpu.dot_dimension_numbers<[1], [0], [0], [1], [0, 0, 1, 1], [], []>} : vector<64x16xf32>, vector<16x128xf32>, vector<64x128xf32> -> vector<64x128xf32>
    %c0_9 = arith.constant 0 : index
    %c0_10 = arith.constant 0 : index
    %24 = vector.load %arg5[%c0_9, %c0_10] : memref<64x128xf32, #tpu.memory_space<vmem>>, vector<64x128xf32>
    tpu.vector_store %arg5[%c0_9, %c0_10], %23 {strides = array<i32>} : memref<64x128xf32, #tpu.memory_space<vmem>>, vector<64x128xf32>,
    return
  }
  func.func @transform_0(%arg0: i32) -> (i32, i32, i32) {
    %c0_i32 = arith.constant 0 : i32
    %c0_i32_0 = arith.constant 0 : i32
    %c0_i32_1 = arith.constant 0 : i32
    return %c0_i32, %arg0, %c0_i32_0 : i32, i32, i32
  }
  func.func @transform_1(%arg0: i32) -> (i32, i32) {
    %c0_i32 = arith.constant 0 : i32
    %c0_i32_0 = arith.constant 0 : i32
    %c0_i32_1 = arith.constant 0 : i32
    return %c0_i32, %c0_i32_0 : i32, i32
  }
  func.func @transform_2(%arg0: i32) -> (i32, i32) {
    %c0_i32 = arith.constant 0 : i32
    %c0_i32_0 = arith.constant 0 : i32
    %c0_i32_1 = arith.constant 0 : i32
    return %c0_i32, %c0_i32_0 : i32, i32
  }
  func.func @transform_3(%arg0: i32) -> (i32, i32) {
    %c0_i32 = arith.constant 0 : i32
    %c0_i32_0 = arith.constant 0 : i32
    %c0_i32_1 = arith.constant 0 : i32
    return %c0_i32, %c0_i32_0 : i32, i32
  }
  func.func @transform_4(%arg0: i32) -> (i32, i32) {
    %c0_i32 = arith.constant 0 : i32
    %c0_i32_0 = arith.constant 0 : i32
    return %arg0, %c0_i32 : i32, i32
  }
}

</mosaic_0001>

<bundles_post_ra>
// kernel: transition_forward.3
= control target key start
LH: loop header
LB: loop body
LE: loop exit
PB: predicated region body
PF: predicated region fallthrough
CT: control target
= control target key end

     0   :  { %9 = vsyncpa [#allocation4], 0  ;;  %s1130_s0 = inlined_call_operand.vmem [shape: f32[4,128,16], index: 0, kind: input, shape index: {}]   ;;  %s1131_s1 = inlined_call_operand.vmem [shape: f32[1,16], index: 1, kind: input, shape index: {}]   ;;  %s1132_s2 = inlined_call_operand.vmem [shape: f32[1,16], index: 2, kind: input, shape index: {}]   ;;  %s1133_s3 = inlined_call_operand.vmem [shape: f32[16,128], index: 3, kind: input, shape index: {}]   ;;  %s1134_s4 = inlined_call_operand.hbm [shape: f32[128,128], index: 4, kind: output, shape index: {}]  }
   0x1   :  { %11 = vsyncpa [#allocation4 + $0x1], 0  ;;  %s842_s15 = smov 0   ;;  %s844_s16 = smov 0  }
   0x2   :  { %s846_s17 = smov 0   ;;  %s848_s18 = smov 0  }
   0x3 LB: > { %s677_s19 = sadd.s32 4294967295, %s813_s18   ;;  %s678_s20 = sadd.s32 4294967294, %s813_s18   ;;  %s813_s18 = sphi %s848_s18, %s1140_s18   ;;  %s809_s17 = sphi %s846_s17, %s1139_s17   ;;  %s805_s16 = sphi %s844_s16, %s1138_s16   ;;  %s801_s15 = sphi %s842_s15, %s1137_s15  }
   0x4   : > { %s865_s21 = sadd.s32 1, %s813_s18   ;;  %s24_s22 = sadd.s32 1, %s809_s17 }
   0x5   : > { %s21_s23 = ssub.s32 %s813_s18, %s865_s21  ;;  %p31_p0 = scmp.ne.s32.totalorder %s809_s17, %s805_s16 }
   0x6   : > { %p22_p1 = scmp.eq.s32.totalorder %s21_s23, 0  ;;  %p32_p2 = scmp.eq.s32.totalorder %s813_s18, 0 }
   0x7   : > { %p124_p3 = scmp.eq.s32.totalorder %s677_s19, 1  ;;  %p129_p4 = scmp.ne.s32.totalorder %s805_s16, %s801_s15 }
   0x8   : > { %s878_s24 = scalar_select %p22_p1, %s809_s17, %s24_s22  }
   0x9   : > { %p33_p5 = por %p32_p2, %p31_p0  ;;  %p880_p6 = por %p124_p3, %p31_p0 }
   0xa   : > { %p130_p7 = scmp.eq.s32.totalorder %s678_s20, 1  ;;  %p680_p9 = scmp.ge.s32.totalorder %s813_s18, 2 }
   0xc   : > { %p884_p8 = por %p130_p7, %p129_p4  ;;  %155 = sbr.rel (%p680_p9) target bundleno = 53 (0x35), region = 28 }
  0x11   : > { %158 = sbr.rel (!%p33_p5) target bundleno = 53 (0x35), region = 32  ;;  %s160_s27 = sand.u32 (%p33_p5), 1, %s809_s17  }
  0x12   : > { %s700_s28 = sshll.u32 (%p33_p5), %s813_s18, 6  ;;  %s681_s29 = sshll.u32 (%p33_p5), %s160_s27, 8 }
  0x13   : > { %s896_s6 = scalar_lea.vmem (%p33_p5), %s1130_s0, %s700_s28  ;;  %s901_s7 = scalar_lea.vmem (%p33_p5), [#allocation2], %s681_s29 }
  0x14   : > { %v256_v0 = vld [vmem:[%s896_s6] sm:$0xff] (%p33_p5)  ;;  %v258_v1 = vld [vmem:[%s896_s6 + $0x8] sm:$0xff] (%p33_p5)  ;;  %v260_v2 = vld [vmem:[%s896_s6 + $0x10] sm:$0xff] (%p33_p5) }
  0x15   : > { %257 = vst [vmem:[%s901_s7] sm:$0xff] (%p33_p5), %v256_v0  ;;  %v262_v3 = vld [vmem:[%s896_s6 + $0x18] sm:$0xff] (%p33_p5)  ;;  %v264_v4 = vld [vmem:[%s896_s6 + $0x20] sm:$0xff] (%p33_p5)  ;;  %v266_v5 = vld [vmem:[%s896_s6 + $0x28] sm:$0xff] (%p33_p5) }
  0x16   : > { %259 = vst [vmem:[%s901_s7 + $0x8] sm:$0xff] %v258_v1  ;;  %v268_v6 = vld [vmem:[%s896_s6 + $0x30] sm:$0xff]  ;;  %v270_v7 = vld [vmem:[%s896_s6 + $0x38] sm:$0xff]  ;;  %v272_v8 = vld [vmem:[%s896_s6 + $0x80] sm:$0xff] }
  0x17   : > { %261 = vst [vmem:[%s901_s7 + $0x10] sm:$0xff] %v260_v2  ;;  %v274_v9 = vld [vmem:[%s896_s6 + $0x88] sm:$0xff]  ;;  %v276_v10 = vld [vmem:[%s896_s6 + $0x90] sm:$0xff]  ;;  %v278_v11 = vld [vmem:[%s896_s6 + $0x98] sm:$0xff] }
  0x18   : > { %263 = vst [vmem:[%s901_s7 + $0x18] sm:$0xff] %v262_v3  ;;  %v280_v12 = vld [vmem:[%s896_s6 + $0xa0] sm:$0xff]  ;;  %v282_v13 = vld [vmem:[%s896_s6 + $0xa8] sm:$0xff]  ;;  %v284_v14 = vld [vmem:[%s896_s6 + $0xb0] sm:$0xff] }
  0x19   : > { %265 = vst [vmem:[%s901_s7 + $0x20] sm:$0xff] %v264_v4  ;;  %v286_v15 = vld [vmem:[%s896_s6 + $0xb8] sm:$0xff]  ;;  %v288_v16 = vld [vmem:[%s896_s6 + $0x100] sm:$0xff]  ;;  %v290_v17 = vld [vmem:[%s896_s6 + $0x108] sm:$0xff] }
  0x1a   : > { %267 = vst [vmem:[%s901_s7 + $0x28] sm:$0xff] %v266_v5  ;;  %v292_v18 = vld [vmem:[%s896_s6 + $0x110] sm:$0xff]  ;;  %v294_v19 = vld [vmem:[%s896_s6 + $0x118] sm:$0xff]  ;;  %v296_v20 = vld [vmem:[%s896_s6 + $0x120] sm:$0xff] }
  0x1b   : > { %269 = vst [vmem:[%s901_s7 + $0x30] sm:$0xff] %v268_v6  ;;  %v298_v21 = vld [vmem:[%s896_s6 + $0x128] sm:$0xff]  ;;  %v300_v22 = vld [vmem:[%s896_s6 + $0x130] sm:$0xff]  ;;  %v302_v23 = vld [vmem:[%s896_s6 + $0x138] sm:$0xff] }
  0x1c   : > { %271 = vst [vmem:[%s901_s7 + $0x38] sm:$0xff] %v270_v7  ;;  %v304_v24 = vld [vmem:[%s896_s6 + $0x180] sm:$0xff]  ;;  %v306_v25 = vld [vmem:[%s896_s6 + $0x188] sm:$0xff]  ;;  %v308_v26 = vld [vmem:[%s896_s6 + $0x190] sm:$0xff] }
  0x1d   : > { %273 = vst [vmem:[%s901_s7 + $0x40] sm:$0xff] %v272_v8  ;;  %v310_v27 = vld [vmem:[%s896_s6 + $0x198] sm:$0xff]  ;;  %v312_v28 = vld [vmem:[%s896_s6 + $0x1a0] sm:$0xff]  ;;  %v314_v29 = vld [vmem:[%s896_s6 + $0x1a8] sm:$0xff] }
  0x1e   : > { %275 = vst [vmem:[%s901_s7 + $0x48] sm:$0xff] %v274_v9  ;;  %v316_v30 = vld [vmem:[%s896_s6 + $0x1b0] sm:$0xff]  ;;  %v318_v31 = vld [vmem:[%s896_s6 + $0x1b8] sm:$0xff] }
  0x1f   : > { %277 = vst [vmem:[%s901_s7 + $0x50] sm:$0xff] %v276_v10 }
  0x20   : > { %279 = vst [vmem:[%s901_s7 + $0x58] sm:$0xff] %v278_v11 }
  0x21   : > { %281 = vst [vmem:[%s901_s7 + $0x60] sm:$0xff] %v280_v12 }
  0x22   : > { %283 = vst [vmem:[%s901_s7 + $0x68] sm:$0xff] %v282_v13 }
  0x23   : > { %285 = vst [vmem:[%s901_s7 + $0x70] sm:$0xff] %v284_v14 }
  0x24   : > { %287 = vst [vmem:[%s901_s7 + $0x78] sm:$0xff] %v286_v15 }
  0x25   : > { %289 = vst [vmem:[%s901_s7 + $0x80] sm:$0xff] %v288_v16 }
  0x26   : > { %291 = vst [vmem:[%s901_s7 + $0x88] sm:$0xff] %v290_v17 }
  0x27   : > { %293 = vst [vmem:[%s901_s7 + $0x90] sm:$0xff] %v292_v18 }
  0x28   : > { %295 = vst [vmem:[%s901_s7 + $0x98] sm:$0xff] %v294_v19 }
  0x29   : > { %297 = vst [vmem:[%s901_s7 + $0xa0] sm:$0xff] %v296_v20 }
  0x2a   : > { %299 = vst [vmem:[%s901_s7 + $0xa8] sm:$0xff] %v298_v21 }
  0x2b   : > { %301 = vst [vmem:[%s901_s7 + $0xb0] sm:$0xff] %v300_v22 }
  0x2c   : > { %303 = vst [vmem:[%s901_s7 + $0xb8] sm:$0xff] %v302_v23 }
  0x2d   : > { %305 = vst [vmem:[%s901_s7 + $0xc0] sm:$0xff] %v304_v24 }
  0x2e   : > { %307 = vst [vmem:[%s901_s7 + $0xc8] sm:$0xff] %v306_v25 }
  0x2f   : > { %309 = vst [vmem:[%s901_s7 + $0xd0] sm:$0xff] %v308_v26 }
  0x30   : > { %311 = vst [vmem:[%s901_s7 + $0xd8] sm:$0xff] %v310_v27 }
  0x31   : > { %313 = vst [vmem:[%s901_s7 + $0xe0] sm:$0xff] %v312_v28 }
  0x32   : > { %315 = vst [vmem:[%s901_s7 + $0xe8] sm:$0xff] %v314_v29 }
  0x33   : > { %317 = vst [vmem:[%s901_s7 + $0xf0] sm:$0xff] %v316_v30 }
  0x34   : > { %319 = vst [vmem:[%s901_s7 + $0xf8] sm:$0xff] %v318_v31 }
  0x35 PF: > { %p684_p10 = scmp.ge.s32.totalorder %s813_s18, 1  ;;  %p324_p11 = scmp.lt.s32.totalorder %s813_s18, 3 }
  0x37   : > { %p325_p12 = pnand %p684_p10, %p324_p11 }
  0x38   : > { %s973_s12 = sand.u32 (!%p325_p12), 1, %s805_s16   ;;  %s701_s30 = sshll.u32 (!%p325_p12), %s677_s19, 6 }
  0x39   : > { %328 = sbr.rel (%p325_p12) target bundleno = 231 (0xe7), region = 70  ;;  %s685_s13 = sshll.u32 (!%p325_p12), %s973_s12, 8 }
  0x3a   : > { %s986_s27 = scalar_lea.vmem (!%p325_p12), [#allocation2], %s685_s13  ;;  %s686_s28 = sshll.u32 (!%p325_p12), %s973_s12, 6 }
  0x3b   : > { %s355_s29 = scalar_lea.vmem (!%p325_p12), [#allocation3], %s686_s28  ;;  %s606_s7 = scalar_lea.hbm (!%p325_p12), %s1134_s4, %s701_s30 }
  0x3c   : > { %s607_s8 = sshll.u32 (!%p325_p12), %s355_s29, 4  ;;  %s1098_s9 = sshll.u32 (!%p325_p12), %s606_s7, 4  ;;  %s608_s8 = int_to_ptr.vmem [resolvable:$true] %s607_s8  ;;  %s610_s9 = int_to_ptr.hbm [resolvable:$true] %s1098_s9 }
  0x3d   : > { %s595_s19 = scalar_lea.sflag (!%p325_p12), [#allocation4], %s973_s12  ;;  %s765_s10 = sshra.s32 (!%p325_p12), %s610_s9, 4  ;;  %s766_s10 = int_to_ptr.hbm [resolvable:$true] %s765_s10 }
  0x3e   : > { %v519_v32 = vld [vmem:[%s1133_s3 + $0x8] sm:$0xff]  ;;  %v518_v33 = vld [vmem:[%s1133_s3] sm:$0xff]  ;;  %v364_v43 = vld [vmem:[%s986_s27 + $0x30] sm:$0xff]  ;;  %vm520_vm0 = vcmask 130048   ;;  %s767_s11 = scalar_lea.hbm %s766_s10, 64  ;;  %s771_s20 = scalar_lea.hbm %s1134_s4, 128 }
  0x3f   : > { %703 = vmatpush.msra.mxu2 %v519_v32  ;;  %704 = vmatpush.msra.mxu3 %v519_v32  ;;  %v979_v34 = vld [vmem:[%s1131_s1] ss:$0 sm:$0xff]  ;;  %v372_v44 = vld [vmem:[%s986_s27 + $0x70] sm:$0xff]  ;;  %v363_v30 = vld [vmem:[%s986_s27 + $0x28] sm:$0xff]  ;;  %p768_p13 = scmp.ne.s32.totalorder %s766_s10, %s767_s11  ;;  %p772_p2 = scmp.lt.s32.totalorder %s766_s10, %s1134_s4 }
  0x40   : > { %v984_v35 = vld [vmem:[%s1132_s2] ss:$0 sm:$0xff]  ;;  %559 = vmatpush.msra.mxu0 %v519_v32  ;;  %702 = vmatpush.msra.mxu1 %v519_v32  ;;  %v380_v46 = vld [vmem:[%s986_s27 + $0xb0] sm:$0xff]  ;;  %v401_v48 = vmul.f32 %v979_v34, %v364_v43  ;;  %v409_v49 = vmul.f32 %v979_v34, %v372_v44  ;;  %v371_v31 = vld [vmem:[%s986_s27 + $0x68] sm:$0xff]  ;;  %p773_p3 = scmp.lt.s32.totalorder %s771_s20, %s767_s11 }
  0x41   : > { %706 = vmatpush.msra.mxu2 %v518_v33  ;;  %707 = vmatpush.msra.mxu3 %v518_v33  ;;  %v362_v36 = vld [vmem:[%s986_s27 + $0x20] sm:$0xff]  ;;  %v388_v47 = vld [vmem:[%s986_s27 + $0xf0] sm:$0xff]  ;;  %v417_v53 = vmul.f32 %v979_v34, %v380_v46  ;;  %v379_v32 = vld [vmem:[%s986_s27 + $0xa8] sm:$0xff]  ;;  %v408_v46 = vmul.f32 %v979_v34, %v371_v31  ;;  %p769_p0 = pnand %p768_p13, %p880_p6 }
  0x42   : > { %v370_v37 = vld [vmem:[%s986_s27 + $0x60] sm:$0xff]  ;;  %v399_v40 = vmul.f32 %v979_v34, %v362_v36  ;;  %560 = vmatpush.msra.mxu0 %v518_v33  ;;  %705 = vmatpush.msra.mxu1 %v518_v33  ;;  %v425_v55 = vmul.f32 %v979_v34, %v388_v47  ;;  %v436_v56 = vadd.f32 %v984_v35, %v401_v48  ;;  %v360_v6 = vld [vmem:[%s986_s27 + $0x10] sm:$0xff]  ;;  %v387_v43 = vld [vmem:[%s986_s27 + $0xe8] sm:$0xff]  ;;  %p774_p4 = por %p773_p3, %p772_p2 }
  0x43   : > { %v378_v38 = vld [vmem:[%s986_s27 + $0xa0] sm:$0xff]  ;;  %v407_v41 = vmul.f32 %v979_v34, %v370_v37  ;;  %v444_v57 = vadd.f32 %v984_v35, %v409_v49  ;;  %v452_v63 = vadd.f32 %v984_v35, %v417_v53  ;;  %v368_v11 = vld [vmem:[%s986_s27 + $0x50] sm:$0xff]  ;;  %v397_v21 = vmul.f32 %v979_v34, %v360_v6  ;;  %v365_v48 = vld [vmem:[%s986_s27 + $0x38] sm:$0xff]  ;;  %p770_p1 = pneg %p769_p0 }
  0x44   : > { %v386_v39 = vld [vmem:[%s986_s27 + $0xe0] sm:$0xff]  ;;  %v415_v42 = vmul.f32 %v979_v34, %v378_v38  ;;  %v434_v50 = vadd.f32 %v984_v35, %v399_v40  ;;  %v460_v3 = vadd.f32 %v984_v35, %v425_v55  ;;  %v468_v4 = vmax.f32 %v436_v56, 0.0  ;;  %v376_v16 = vld [vmem:[%s986_s27 + $0x90] sm:$0xff]  ;;  %v373_v53 = vld [vmem:[%s986_s27 + $0x78] sm:$0xff] }
  0x45   : > { %v423_v45 = vmul.f32 %v979_v34, %v386_v39  ;;  %v442_v51 = vadd.f32 %v984_v35, %v407_v41  ;;  %v358_v58 = vld [vmem:[%s986_s27] sm:$0xff]  ;;  %v476_v5 = vmax.f32 %v444_v57, 0.0  ;;  %v484_v8 = vmax.f32 %v452_v63, 0.0  ;;  %v384_v20 = vld [vmem:[%s986_s27 + $0xd0] sm:$0xff]  ;;  %p775_p5 = pnand %p774_p4, %p770_p1 }
  0x46   : > { %v450_v52 = vadd.f32 %v984_v35, %v415_v42  ;;  %v366_v59 = vld [vmem:[%s986_s27 + $0x40] sm:$0xff]  ;;  %v466_v60 = vmax.f32 %v434_v50, 0.0  ;;  %v395_v9 = vmul.f32 %v979_v34, %v358_v58  ;;  %v492_v12 = vmax.f32 %v460_v3, 0.0  ;;  %v381_v58 = vld [vmem:[%s986_s27 + $0xb8] sm:$0xff] }
  0x47   : > { %v458_v54 = vadd.f32 %v984_v35, %v423_v45  ;;  %v474_v61 = vmax.f32 %v442_v51, 0.0  ;;  %v374_v0 = vld [vmem:[%s986_s27 + $0x80] sm:$0xff]  ;;  %v403_v10 = vmul.f32 %v979_v34, %v366_v59  ;;  %v500_v13 = vadd.f32 %v476_v5, %v468_v4  ;;  %v389_v59 = vld [vmem:[%s986_s27 + $0xf8] sm:$0xff]  ;;  %v359_v4 = vld [vmem:[%s986_s27 + $0x8] sm:$0xff] }
  0x48   : > { %v482_v62 = vmax.f32 %v450_v52, 0.0  ;;  %v382_v1 = vld [vmem:[%s986_s27 + $0xc0] sm:$0xff]  ;;  %v411_v14 = vmul.f32 %v979_v34, %v374_v0  ;;  %v430_v18 = vadd.f32 %v984_v35, %v395_v9  ;;  %v405_v25 = vmul.f32 %v979_v34, %v368_v11  ;;  %v367_v9 = vld [vmem:[%s986_s27 + $0x48] sm:$0xff] }
  0x49   : > { %v490_v2 = vmax.f32 %v458_v54, 0.0  ;;  %v498_v7 = vadd.f32 %v474_v61, %v466_v60  ;;  %v419_v15 = vmul.f32 %v979_v34, %v382_v1  ;;  %v438_v19 = vadd.f32 %v984_v35, %v403_v10 }
  0x4a   : > { %v508_v22 = vadd.f32 %v500_v13, %v484_v8  ;;  %v446_v23 = vadd.f32 %v984_v35, %v411_v14  ;;  %v462_v27 = vmax.f32 %v430_v18, 0.0  ;;  %v413_v29 = vmul.f32 %v979_v34, %v376_v16  ;;  %v375_v14 = vld [vmem:[%s986_s27 + $0x88] sm:$0xff] }
  0x4b   : > { %v506_v17 = vadd.f32 %v498_v7, %v482_v62  ;;  %v454_v24 = vadd.f32 %v984_v35, %v419_v15  ;;  %v470_v28 = vmax.f32 %v438_v19, 0.0  ;;  %v421_v38 = vmul.f32 %v979_v34, %v384_v20  ;;  %v383_v15 = vld [vmem:[%s986_s27 + $0xc8] sm:$0xff] }
  0x4c   : > { %v516_v33 = vadd.f32 %v508_v22, %v492_v12  ;;  %v478_v36 = vmax.f32 %v446_v23, 0.0  ;;  %v432_v40 = vadd.f32 %v984_v35, %v397_v21  ;;  %v440_v41 = vadd.f32 %v984_v35, %v405_v25  ;;  %v369_v25 = vld [vmem:[%s986_s27 + $0x58] sm:$0xff] }
  0x4d   : > { %v514_v26 = vadd.f32 %v506_v17, %v490_v2  ;;  %v486_v37 = vmax.f32 %v454_v24, 0.0  ;;  %v494_v39 = vadd.f32 %v470_v28, %v462_v27  ;;  %v448_v42 = vadd.f32 %v984_v35, %v413_v29  ;;  %v361_v24 = vld [vmem:[%s986_s27 + $0x18] sm:$0xff] }
  0x4e   : > { %693 = vmatmul.msk.f32.vlgmr.msra.gmra.mxu3 %vm520_vm0, %v516_v33  ;;  %v456_v44 = vadd.f32 %v984_v35, %v421_v38  ;;  %v400_v45 = vmul.f32 %v979_v34, %v363_v30  ;;  %v416_v47 = vmul.f32 %v979_v34, %v379_v32  ;;  %v464_v50 = vmax.f32 %v432_v40, 0.0  ;;  %v377_v30 = vld [vmem:[%s986_s27 + $0x98] sm:$0xff] }
  0x4f   : > { %691 = vmatmul.msk.f32.vlgmr.msra.gmra.mxu2 %vm520_vm0, %v514_v26  ;;  %v502_v49 = vadd.f32 %v494_v39, %v478_v36  ;;  %v472_v51 = vmax.f32 %v440_v41, 0.0  ;;  %v480_v52 = vmax.f32 %v448_v42, 0.0  ;;  %v424_v55 = vmul.f32 %v979_v34, %v387_v43 }
  0x50   : > { %v488_v54 = vmax.f32 %v456_v44, 0.0  ;;  %v435_v56 = vadd.f32 %v984_v35, %v400_v45  ;;  %v443_v57 = vadd.f32 %v984_v35, %v408_v46  ;;  %v451_v62 = vadd.f32 %v984_v35, %v416_v47 }
  0x51   : > { %v510_v60 = vadd.f32 %v502_v49, %v486_v37  ;;  %v496_v61 = vadd.f32 %v472_v51, %v464_v50  ;;  %v402_v63 = vmul.f32 %v979_v34, %v365_v48  ;;  %v459_v0 = vadd.f32 %v984_v35, %v424_v55  ;;  %v385_v37 = vld [vmem:[%s986_s27 + $0xd8] sm:$0xff] }
  0x52   : > { %v467_v1 = vmax.f32 %v435_v56, 0.0  ;;  %v475_v2 = vmax.f32 %v443_v57, 0.0  ;;  %v410_v3 = vmul.f32 %v979_v34, %v373_v53  ;;  %v483_v6 = vmax.f32 %v451_v62, 0.0 }
  0x53   : > { %687 = vmatmul.msk.f32.vlgmr.msra.gmra.mxu0 %vm520_vm0, %v510_v60  ;;  %v504_v5 = vadd.f32 %v496_v61, %v480_v52  ;;  %v418_v7 = vmul.f32 %v979_v34, %v381_v58  ;;  %v426_v8 = vmul.f32 %v979_v34, %v389_v59  ;;  %v491_v10 = vmax.f32 %v459_v0, 0.0 }
  0x54   : > { %v499_v11 = vadd.f32 %v475_v2, %v467_v1  ;;  %v437_v12 = vadd.f32 %v984_v35, %v402_v63  ;;  %v445_v13 = vadd.f32 %v984_v35, %v410_v3  ;;  %v396_v19 = vmul.f32 %v979_v34, %v359_v4 }
  0x55   : > { %v512_v16 = vadd.f32 %v504_v5, %v488_v54  ;;  %v453_v17 = vadd.f32 %v984_v35, %v418_v7  ;;  %v461_v18 = vadd.f32 %v984_v35, %v426_v8  ;;  %v404_v23 = vmul.f32 %v979_v34, %v367_v9 }
  0x56   : > { %v507_v20 = vadd.f32 %v499_v11, %v483_v6  ;;  %v469_v21 = vmax.f32 %v437_v12, 0.0  ;;  %v477_v22 = vmax.f32 %v445_v13, 0.0  ;;  %v412_v28 = vmul.f32 %v979_v34, %v375_v14 }
  0x57   : > { %689 = vmatmul.msk.f32.vlgmr.msra.gmra.mxu1 %vm520_vm0, %v512_v16  ;;  %v485_v26 = vmax.f32 %v453_v17, 0.0  ;;  %v493_v27 = vmax.f32 %v461_v18, 0.0  ;;  %v420_v29 = vmul.f32 %v979_v34, %v383_v15  ;;  %v431_v33 = vadd.f32 %v984_v35, %v396_v19 }
  0x58   : > { %v515_v31 = vadd.f32 %v507_v20, %v491_v10  ;;  %v501_v32 = vadd.f32 %v477_v22, %v469_v21  ;;  %v439_v36 = vadd.f32 %v984_v35, %v404_v23  ;;  %v447_v38 = vadd.f32 %v984_v35, %v412_v28 }
  0x59   : > { %v455_v39 = vadd.f32 %v984_v35, %v420_v29  ;;  %v398_v40 = vmul.f32 %v979_v34, %v361_v24  ;;  %v406_v41 = vmul.f32 %v979_v34, %v369_v25  ;;  %v463_v43 = vmax.f32 %v431_v33, 0.0 }
  0x5a   : > { %692 = vmatmul.msk.f32.gmra.mxu2 %vm520_vm0, %v515_v31  ;;  %v509_v42 = vadd.f32 %v501_v32, %v485_v26  ;;  %v471_v44 = vmax.f32 %v439_v36, 0.0  ;;  %v414_v45 = vmul.f32 %v979_v34, %v377_v30  ;;  %v479_v46 = vmax.f32 %v447_v38, 0.0 }
  0x5b   : > { %v487_v47 = vmax.f32 %v455_v39, 0.0  ;;  %v422_v48 = vmul.f32 %v979_v34, %v385_v37  ;;  %v433_v49 = vadd.f32 %v984_v35, %v398_v40  ;;  %v441_v52 = vadd.f32 %v984_v35, %v406_v41 }
  0x5c   : > { %v517_v50 = vadd.f32 %v509_v42, %v493_v27  ;;  %v495_v51 = vadd.f32 %v471_v44, %v463_v43  ;;  %v449_v53 = vadd.f32 %v984_v35, %v414_v45 }
  0x5d   : > { %v457_v54 = vadd.f32 %v984_v35, %v422_v48  ;;  %v465_v55 = vmax.f32 %v433_v49, 0.0  ;;  %v473_v57 = vmax.f32 %v441_v52, 0.0 }
  0x5e   : > { %694 = vmatmul.msk.f32.gmra.mxu3 %vm520_vm0, %v517_v50  ;;  %v503_v56 = vadd.f32 %v495_v51, %v479_v46  ;;  %v481_v58 = vmax.f32 %v449_v53, 0.0 }
  0x5f   : > { %v489_v60 = vmax.f32 %v457_v54, 0.0  ;;  %v497_v34 = vadd.f32 %v473_v57, %v465_v55 }
  0x60   : > { %v511_v59 = vadd.f32 %v503_v56, %v487_v47 }
  0x61   : > { %v505_v61 = vadd.f32 %v497_v34, %v481_v58 }
  0x62   : > { %688 = vmatmul.msk.f32.gmra.mxu0 %vm520_vm0, %v511_v59 }
  0x63   : > { %v513_v62 = vadd.f32 %v505_v61, %v489_v60 }
  0x65   : > { %690 = vmatmul.msk.f32.gmra.mxu1 %vm520_vm0, %v513_v62 }
  0xd0   : > { %v562_v63 = vpop.f32.mrf.mxu0 }
  0xd1   : > { %586 = vst [vmem:[%s355_s29] sm:$0xff] %v562_v63  ;;  %v580_v35 = vpop.f32.mrf.mxu3 }
  0xd2   : > { %v574_v0 = vpop.f32.mrf.mxu2  ;;  %592 = vst [vmem:[%s355_s29 + $0x30] sm:$0xff] %v580_v35 }
  0xd3   : > { %590 = vst [vmem:[%s355_s29 + $0x20] sm:$0xff] %v574_v0 }
  0xd4   : > { %v568_v1 = vpop.f32.mrf.mxu1 }
  0xd5   : > { %588 = vst [vmem:[%s355_s29 + $0x10] sm:$0xff] %v568_v1 }
  0xdd   : > { %v577_v2 = vpop.f32.mrf.mxu2 }
  0xde   : > { %591 = vst [vmem:[%s355_s29 + $0x28] sm:$0xff] %v577_v2 }
  0xdf   : > { %v565_v3 = vpop.f32.mrf.mxu0 }
  0xe0   : > { %587 = vst [vmem:[%s355_s29 + $0x8] sm:$0xff] %v565_v3 }
  0xe1   : > { %v583_v4 = vpop.f32.mrf.mxu3 }
  0xe2   : > { %593 = vst [vmem:[%s355_s29 + $0x38] sm:$0xff] %v583_v4  ;;  %v571_v5 = vpop.f32.mrf.mxu1 }
  0xe3   : > { %589 = vst [vmem:[%s355_s29 + $0x18] sm:$0xff] %v571_v5 }
  0xe4   : > { %778 = shalt.err (!%p775_p5)
}
  0xe5   : > { %s815_s12 = smov 128   ;;  %s816_s27 = smov 8  }
  0xe6   : > { %708 = dma.vmem_to_hbm [thread:$0]  (%p880_p6), %s608_s8, 1024, %s610_s9, %s595_s19, %s815_s12, %s815_s12, %s816_s27  }
  0xe7 PF: > { %s624_s28 = sand.u32 1, %s801_s15   ;;  %p711_p7 = pnand %p680_p9, %p884_p8 }
  0xe8   : > { %s625_s29 = scalar_lea.sflag [#allocation4], %s624_s28 }
  0xe9   : > { %p712_p10 = pneg %p711_p7 }
  0xeb   : > { %796 = dma.done.wait (%p712_p10), %s625_s29, 1024  }
  0xec   : > { %798 = vsyncadd (%p712_p10), %s625_s29, 4294966272  ;;  %p14_p11 = scmp.ge.s32.totalorder %s865_s21, 4   ;;  %s1137_s15 = smov %s805_s16 }
  0xed   : > { %s1138_s16 = smov %s809_s17  ;;  %s1139_s17 = smov %s878_s24 }
  0xee   : > { %s1140_s18 = smov %s865_s21  ;;  %16 = sbr.rel (!%p14_p11) target bundleno = 3 (0x3), region = 114 }
  0xf3   :  { %631 = vsyncpa [#allocation4], 1 }
  0xf4   :  { %633 = vsyncpa [#allocation4 + $0x1], 1 }

// kernel: transition_forward.2
= control target key start
LH: loop header
LB: loop body
LE: loop exit
PB: predicated region body
PF: predicated region fallthrough
CT: control target
= control target key end

     0   :  { %s469_s9 = smov 0   ;;  %s592_s0 = inlined_call_operand.vmem [shape: f32[512,16], index: 0, kind: input, shape index: {}]   ;;  %s593_s1 = inlined_call_operand.vmem [shape: f32[2,1,16], index: 1, kind: output, shape index: {0}]   ;;  %s594_s2 = inlined_call_operand.vmem [shape: f32[2,1,16], index: 2, kind: output, shape index: {1}]  }
   0x1 LB: > { %s475_s10 = sadd.s32 4294967295, %s452_s9   ;;  %p433_p0 = scmp.ge.s32.totalorder %s452_s9, 1  ;;  %s452_s9 = sphi %s469_s9, %s13_s9  }
   0x2   : > { %p116_p1 = scmp.lt.s32.totalorder %s452_s9, 3 }
   0x4   : > { %p117_p2 = pnand %p433_p0, %p116_p1 }
   0x5   : > { %s434_s11 = sshll.u32 (!%p117_p2), %s475_s10, 5  ;;  %p145_p4 = scmp.lt.s32.totalorder (!%p117_p2), %s475_s10, 1 }
   0x6   : > { %120 = sbr.rel (%p117_p2) target bundleno = 95 (0x5f), region = 24  ;;  %p140_p3 = scmp.lt.s32.totalorder (!%p117_p2), %s434_s11, 63 }
   0xb   : > { %s596_s11 = smov (!%p140_p3, %s434_s11), 63  ;;  %vm183_vm0 = vcmask 130048   ;;  %s598_s10 = smov (!%p145_p4, %s475_s10), 1  ;;  %vm253_vm1 = vcmask 122880  }
   0xc   : > { %s435_s12 = sshll.u32 %s596_s11, 3  ;;  %s147_s18 = scalar_lea.vmem %s593_s1, %s598_s10 }
   0xd   : > { %s483_s15 = scalar_lea.vmem %s592_s0, %s435_s12  ;;  %s150_s21 = scalar_lea.vmem %s594_s2, %s598_s10 }
   0xe   : > { %v151_v0 = vld [vmem:[%s483_s15] sm:$0xff]  ;;  %v152_v1 = vld [vmem:[%s483_s15 + $0x8] sm:$0xff]  ;;  %v153_v2 = vld [vmem:[%s483_s15 + $0x10] sm:$0xff] }
   0xf   : > { %v184_v3 = vsel %vm183_vm0, %v151_v0, 0.0  ;;  %v185_v4 = vsel %vm183_vm0, %v152_v1, 0.0  ;;  %v187_v5 = vsel %vm183_vm0, %v153_v2, 0.0  ;;  %v154_v6 = vld [vmem:[%s483_s15 + $0x18] sm:$0xff]  ;;  %v155_v9 = vld [vmem:[%s483_s15 + $0x20] sm:$0xff]  ;;  %v156_v12 = vld [vmem:[%s483_s15 + $0x28] sm:$0xff]  ;;  %v255_v20 = vmul.f32 %v151_v0, %v151_v0 }
  0x10   : > { %v186_v7 = vadd.f32 %v185_v4, %v184_v3  ;;  %v189_v8 = vsel %vm183_vm0, %v154_v6, 0.0  ;;  %v191_v11 = vsel %vm183_vm0, %v155_v9, 0.0  ;;  %v193_v14 = vsel %vm183_vm0, %v156_v12, 0.0  ;;  %v157_v15 = vld [vmem:[%s483_s15 + $0x30] sm:$0xff]  ;;  %v158_v18 = vld [vmem:[%s483_s15 + $0x38] sm:$0xff]  ;;  %v159_v24 = vld [vmem:[%s483_s15 + $0x40] sm:$0xff] }
  0x11   : > { %v195_v17 = vsel %vm183_vm0, %v157_v15, 0.0  ;;  %v197_v21 = vsel %vm183_vm0, %v158_v18, 0.0  ;;  %v256_v22 = vmul.f32 %v152_v1, %v152_v1  ;;  %v257_v23 = vmul.f32 %v153_v2, %v153_v2  ;;  %v160_v28 = vld [vmem:[%s483_s15 + $0x48] sm:$0xff]  ;;  %v161_v35 = vld [vmem:[%s483_s15 + $0x50] sm:$0xff]  ;;  %v162_v41 = vld [vmem:[%s483_s15 + $0x58] sm:$0xff] }
  0x12   : > { %v188_v10 = vadd.f32 %v187_v5, %v186_v7  ;;  %v199_v26 = vsel %vm183_vm0, %v159_v24, 0.0  ;;  %v258_v27 = vmul.f32 %v154_v6, %v154_v6  ;;  %v287_v30 = vsel %vm183_vm0, %v255_v20, 0.0  ;;  %v163_v47 = vld [vmem:[%s483_s15 + $0x60] sm:$0xff]  ;;  %v164_v53 = vld [vmem:[%s483_s15 + $0x68] sm:$0xff]  ;;  %v165_v59 = vld [vmem:[%s483_s15 + $0x70] sm:$0xff] }
  0x13   : > { %v201_v31 = vsel %vm183_vm0, %v160_v28, 0.0  ;;  %v259_v32 = vmul.f32 %v155_v9, %v155_v9  ;;  %v288_v33 = vsel %vm183_vm0, %v256_v22, 0.0  ;;  %v290_v34 = vsel %vm183_vm0, %v257_v23, 0.0  ;;  %v166_v1 = vld [vmem:[%s483_s15 + $0x78] sm:$0xff]  ;;  %v167_v7 = vld [vmem:[%s483_s15 + $0x80] sm:$0xff] }
  0x14   : > { %v190_v13 = vadd.f32 %v189_v8, %v188_v10  ;;  %v289_v37 = vadd.f32 %v288_v33, %v287_v30  ;;  %v203_v38 = vsel %vm183_vm0, %v161_v35, 0.0  ;;  %v260_v39 = vmul.f32 %v156_v12, %v156_v12 }
  0x15   : > { %v292_v40 = vsel %vm183_vm0, %v258_v27, 0.0  ;;  %v205_v44 = vsel %vm183_vm0, %v162_v41, 0.0  ;;  %v261_v45 = vmul.f32 %v157_v15, %v157_v15  ;;  %v294_v46 = vsel %vm183_vm0, %v259_v32, 0.0 }
  0x16   : > { %v192_v16 = vadd.f32 %v191_v11, %v190_v13  ;;  %v291_v43 = vadd.f32 %v290_v34, %v289_v37  ;;  %v207_v50 = vsel %vm183_vm0, %v163_v47, 0.0  ;;  %v262_v51 = vmul.f32 %v158_v18, %v158_v18  ;;  %v168_v13 = vld [vmem:[%s483_s15 + $0x88] sm:$0xff] }
  0x17   : > { %v296_v52 = vsel %vm183_vm0, %v260_v39, 0.0  ;;  %v209_v56 = vsel %vm183_vm0, %v164_v53, 0.0  ;;  %v263_v57 = vmul.f32 %v159_v24, %v159_v24  ;;  %v298_v58 = vsel %vm183_vm0, %v261_v45, 0.0  ;;  %v172_v37 = vld [vmem:[%s483_s15 + $0xa8] sm:$0xff] }
  0x18   : > { %v194_v19 = vadd.f32 %v193_v14, %v192_v16  ;;  %v293_v49 = vadd.f32 %v292_v40, %v291_v43  ;;  %v211_v62 = vsel %vm183_vm0, %v165_v59, 0.0  ;;  %v264_v63 = vmul.f32 %v160_v28, %v160_v28  ;;  %v173_v43 = vld [vmem:[%s483_s15 + $0xb0] sm:$0xff] }
  0x19   : > { %v300_v0 = vsel %vm183_vm0, %v262_v51, 0.0  ;;  %v213_v4 = vsel %vm183_vm0, %v166_v1, 0.0  ;;  %v265_v5 = vmul.f32 %v161_v35, %v161_v35  ;;  %v302_v6 = vsel %vm183_vm0, %v263_v57, 0.0 }
  0x1a   : > { %v196_v25 = vadd.f32 %v195_v17, %v194_v19  ;;  %v295_v55 = vadd.f32 %v294_v46, %v293_v49  ;;  %v215_v10 = vsel %vm183_vm0, %v167_v7, 0.0  ;;  %v266_v11 = vmul.f32 %v162_v41, %v162_v41  ;;  %v169_v19 = vld [vmem:[%s483_s15 + $0x90] sm:$0xff]  ;;  %v174_v49 = vld [vmem:[%s483_s15 + $0xb8] sm:$0xff] }
  0x1b   : > { %v304_v12 = vsel %vm183_vm0, %v264_v63, 0.0  ;;  %v217_v16 = vsel %vm183_vm0, %v168_v13, 0.0  ;;  %v267_v17 = vmul.f32 %v163_v47, %v163_v47  ;;  %v306_v18 = vsel %vm183_vm0, %v265_v5, 0.0 }
  0x1c   : > { %v198_v29 = vadd.f32 %v197_v21, %v196_v25  ;;  %v297_v61 = vadd.f32 %v296_v52, %v295_v55  ;;  %v219_v22 = vsel %vm183_vm0, %v169_v19, 0.0  ;;  %v268_v23 = vmul.f32 %v164_v53, %v164_v53  ;;  %v170_v25 = vld [vmem:[%s483_s15 + $0x98] sm:$0xff]  ;;  %v175_v55 = vld [vmem:[%s483_s15 + $0xc0] sm:$0xff] }
  0x1d   : > { %v308_v24 = vsel %vm183_vm0, %v266_v11, 0.0  ;;  %v221_v28 = vsel %vm183_vm0, %v170_v25, 0.0  ;;  %v310_v30 = vsel %vm183_vm0, %v267_v17, 0.0  ;;  %v270_v35 = vmul.f32 %v166_v1, %v166_v1 }
  0x1e   : > { %v200_v36 = vadd.f32 %v199_v26, %v198_v29  ;;  %v299_v3 = vadd.f32 %v298_v58, %v297_v61  ;;  %v269_v29 = vmul.f32 %v165_v59, %v165_v59  ;;  %v225_v40 = vsel %vm183_vm0, %v172_v37, 0.0  ;;  %v176_v61 = vld [vmem:[%s483_s15 + $0xc8] sm:$0xff] }
  0x1f   : > { %v271_v41 = vmul.f32 %v167_v7, %v167_v7  ;;  %v227_v46 = vsel %vm183_vm0, %v173_v43, 0.0  ;;  %v272_v47 = vmul.f32 %v168_v13, %v168_v13  ;;  %v229_v52 = vsel %vm183_vm0, %v174_v49, 0.0 }
  0x20   : > { %v202_v42 = vadd.f32 %v201_v31, %v200_v36  ;;  %v301_v9 = vadd.f32 %v300_v0, %v299_v3  ;;  %v171_v31 = vld [vmem:[%s483_s15 + $0xa0] sm:$0xff]  ;;  %v312_v36 = vsel %vm183_vm0, %v268_v23, 0.0  ;;  %v273_v53 = vmul.f32 %v169_v19, %v169_v19  ;;  %v177_v3 = vld [vmem:[%s483_s15 + $0xd0] sm:$0xff] }
  0x21   : > { %v223_v34 = vsel %vm183_vm0, %v171_v31, 0.0  ;;  %v231_v58 = vsel %vm183_vm0, %v175_v55, 0.0  ;;  %v274_v59 = vmul.f32 %v170_v25, %v170_v25  ;;  %v233_v0 = vsel %vm183_vm0, %v176_v61, 0.0 }
  0x22   : > { %v204_v48 = vadd.f32 %v203_v38, %v202_v42  ;;  %v303_v15 = vadd.f32 %v302_v6, %v301_v9  ;;  %v314_v42 = vsel %vm183_vm0, %v269_v29, 0.0  ;;  %v275_v1 = vmul.f32 %v171_v31, %v171_v31  ;;  %v178_v9 = vld [vmem:[%s483_s15 + $0xd8] sm:$0xff] }
  0x23   : > { %v235_v6 = vsel %vm183_vm0, %v177_v3, 0.0  ;;  %v276_v7 = vmul.f32 %v172_v37, %v172_v37  ;;  %v277_v13 = vmul.f32 %v173_v43, %v173_v43  ;;  %v278_v19 = vmul.f32 %v174_v49, %v174_v49 }
  0x24   : > { %v206_v54 = vadd.f32 %v205_v44, %v204_v48  ;;  %v305_v21 = vadd.f32 %v304_v12, %v303_v15  ;;  %v316_v48 = vsel %vm183_vm0, %v270_v35, 0.0  ;;  %v237_v12 = vsel %vm183_vm0, %v178_v9, 0.0  ;;  %v179_v15 = vld [vmem:[%s483_s15 + $0xe0] sm:$0xff] }
  0x25   : > { %v279_v25 = vmul.f32 %v175_v55, %v175_v55  ;;  %v280_v31 = vmul.f32 %v176_v61, %v176_v61  ;;  %v281_v37 = vmul.f32 %v177_v3, %v177_v3 }
  0x26   : > { %v208_v60 = vadd.f32 %v207_v50, %v206_v54  ;;  %v307_v27 = vadd.f32 %v306_v18, %v305_v21  ;;  %v318_v54 = vsel %vm183_vm0, %v271_v41, 0.0  ;;  %v239_v18 = vsel %vm183_vm0, %v179_v15, 0.0  ;;  %v180_v21 = vld [vmem:[%s483_s15 + $0xe8] sm:$0xff] }
  0x27   : > { %v282_v41 = vmul.f32 %v178_v9, %v178_v9  ;;  %v284_v49 = vmul.f32 %v180_v21, %v180_v21 }
  0x28   : > { %v210_v2 = vadd.f32 %v209_v56, %v208_v60  ;;  %v309_v33 = vadd.f32 %v308_v24, %v307_v27  ;;  %v320_v60 = vsel %vm183_vm0, %v272_v47, 0.0  ;;  %v241_v24 = vsel %vm183_vm0, %v180_v21, 0.0  ;;  %v181_v27 = vld [vmem:[%s483_s15 + $0xf0] sm:$0xff] }
  0x2a   : > { %v212_v8 = vadd.f32 %v211_v62, %v210_v2  ;;  %v311_v39 = vadd.f32 %v310_v30, %v309_v33  ;;  %v322_v2 = vsel %vm183_vm0, %v273_v53, 0.0  ;;  %v243_v30 = vsel %vm183_vm0, %v181_v27, 0.0  ;;  %v182_v33 = vld [vmem:[%s483_s15 + $0xf8] sm:$0xff] }
  0x2b   : > { %v285_v53 = vmul.f32 %v181_v27, %v181_v27 }
  0x2c   : > { %v214_v14 = vadd.f32 %v213_v4, %v212_v8  ;;  %v313_v45 = vadd.f32 %v312_v36, %v311_v39  ;;  %v324_v8 = vsel %vm183_vm0, %v274_v59, 0.0  ;;  %v245_v36 = vsel %vm183_vm0, %v182_v33, 0.0 }
  0x2d   : > { %v346_v61 = vsel %vm183_vm0, %v285_v53, 0.0 }
  0x2e   : > { %v216_v20 = vadd.f32 %v215_v10, %v214_v14  ;;  %v315_v51 = vadd.f32 %v314_v42, %v313_v45  ;;  %v326_v14 = vsel %vm183_vm0, %v275_v1, 0.0  ;;  %v336_v42 = vsel %vm183_vm0, %v280_v31, 0.0 }
  0x2f   : > { %v283_v45 = vmul.f32 %v179_v15, %v179_v15 }
  0x30   : > { %v218_v26 = vadd.f32 %v217_v16, %v216_v20  ;;  %v317_v57 = vadd.f32 %v316_v48, %v315_v51  ;;  %v328_v20 = vsel %vm183_vm0, %v276_v7, 0.0 }
  0x32   : > { %v220_v32 = vadd.f32 %v219_v22, %v218_v26  ;;  %v319_v63 = vadd.f32 %v318_v54, %v317_v57  ;;  %v330_v26 = vsel %vm183_vm0, %v277_v13, 0.0  ;;  %v342_v54 = vsel %vm183_vm0, %v283_v45, 0.0 }
  0x33   : > { %v286_v57 = vmul.f32 %v182_v33, %v182_v33 }
  0x34   : > { %v222_v38 = vadd.f32 %v221_v28, %v220_v32  ;;  %v321_v5 = vadd.f32 %v320_v60, %v319_v63  ;;  %v332_v32 = vsel %vm183_vm0, %v278_v19, 0.0 }
  0x36   : > { %v224_v44 = vadd.f32 %v223_v34, %v222_v38  ;;  %v323_v11 = vadd.f32 %v322_v2, %v321_v5  ;;  %v334_v38 = vsel %vm183_vm0, %v279_v25, 0.0 }
  0x38   : > { %v226_v50 = vadd.f32 %v225_v40, %v224_v44  ;;  %v325_v17 = vadd.f32 %v324_v8, %v323_v11 }
  0x3a   : > { %v228_v56 = vadd.f32 %v227_v46, %v226_v50  ;;  %v327_v23 = vadd.f32 %v326_v14, %v325_v17  ;;  %v338_v46 = vsel %vm183_vm0, %v281_v37, 0.0  ;;  %v340_v50 = vsel %vm183_vm0, %v282_v41, 0.0 }
  0x3c   : > { %v230_v62 = vadd.f32 %v229_v52, %v228_v56  ;;  %v329_v29 = vadd.f32 %v328_v20, %v327_v23 }
  0x3e   : > { %v232_v4 = vadd.f32 %v231_v58, %v230_v62  ;;  %v331_v35 = vadd.f32 %v330_v26, %v329_v29  ;;  %v344_v58 = vsel %vm183_vm0, %v284_v49, 0.0 }
  0x40   : > { %v234_v10 = vadd.f32 %v233_v0, %v232_v4  ;;  %v333_v40 = vadd.f32 %v332_v32, %v331_v35  ;;  %v348_v0 = vsel %vm183_vm0, %v286_v57, 0.0 }
  0x42   : > { %v236_v16 = vadd.f32 %v235_v6, %v234_v10  ;;  %v335_v44 = vadd.f32 %v334_v38, %v333_v40 }
  0x44   : > { %v238_v22 = vadd.f32 %v237_v12, %v236_v16  ;;  %v337_v48 = vadd.f32 %v336_v42, %v335_v44 }
  0x46   : > { %v240_v28 = vadd.f32 %v239_v18, %v238_v22  ;;  %v339_v52 = vadd.f32 %v338_v46, %v337_v48 }
  0x48   : > { %v242_v34 = vadd.f32 %v241_v24, %v240_v28  ;;  %v341_v56 = vadd.f32 %v340_v50, %v339_v52 }
  0x4a   : > { %v244_v39 = vadd.f32 %v243_v30, %v242_v34  ;;  %v343_v60 = vadd.f32 %v342_v54, %v341_v56 }
  0x4c   : > { %v246_v43 = vadd.f32 %v245_v36, %v244_v39  ;;  %v345_v63 = vadd.f32 %v344_v58, %v343_v60 }
  0x4e   : > { %v247_v47 = vrot.slane %v246_v43, 4  ;;  %v347_v2 = vadd.f32 %v346_v61, %v345_v63 }
  0x50   : > { %v248_v51 = vadd.f32 %v247_v47, %v246_v43  ;;  %v349_v3 = vadd.f32 %v348_v0, %v347_v2 }
  0x52   : > { %v249_v55 = vrot.slane %v248_v51, 2  ;;  %v350_v4 = vrot.slane %v349_v3, 4 }
  0x54   : > { %v250_v59 = vadd.f32 %v249_v55, %v248_v51  ;;  %v351_v5 = vadd.f32 %v350_v4, %v349_v3 }
  0x56   : > { %v251_v62 = vrot.slane %v250_v59, 1  ;;  %v352_v6 = vrot.slane %v351_v5, 2 }
  0x58   : > { %v252_v1 = vadd.f32 %v251_v62, %v250_v59  ;;  %v353_v7 = vadd.f32 %v352_v6, %v351_v5 }
  0x5a   : > { %254 = vst.msk [vmem:[%s147_s18] sm:$0x1] %vm253_vm1, %v252_v1  ;;  %v354_v8 = vrot.slane %v353_v7, 1 }
  0x5c   : > { %v355_v9 = vadd.f32 %v354_v8, %v353_v7 }
  0x5e   : > { %356 = vst.msk [vmem:[%s150_s21] sm:$0x1] %vm253_vm1, %v355_v9 }
  0x5f PF: > { %s13_s9 = sadd.s32 1, %s452_s9  }
  0x60   : > { %p10_p5 = scmp.ge.s32.totalorder %s13_s9, 4  }
  0x62   :  { %12 = sbr.rel (!%p10_p5) target bundleno = 1 (0x1), region = 66 }

</bundles_post_ra>
